<compile_context>
chip_gen: v6e
topology: v6e:2x2x1
jax: 0.10.0
libtpu: 0.0.40
codegen_flags: <defaults>
</compile_context>

<pallas_src>
import functools
import math

import jax
import jax.numpy as jnp
from jax import lax
from jax.experimental import pallas as pl
from jax.experimental.pallas import tpu as pltpu

NUM_NEURONS = 128          # num_neurons
SYNAPSES_PER_NEURON = 16   # synapses_per_neuron
NUM_TIMESTEPS = 4          # num_timesteps
BATCH = NUM_NEURONS        # required by the `output += bias` last-axis broadcast


def _cortical_rnn_kernel(w_ref, b_ref, x_ref, o_ref, *, num_timesteps):
    """Runs all recurrent timesteps in one invocation, fully VMEM-resident.

    w_ref: (N, N) bf16   dense-ified sparse weight (cast once at init)
    b_ref: (1, N) f32    bias, added along the LAST axis (PyTorch broadcast quirk)
    x_ref: (N, B) f32    input state
    o_ref: (N, B) f32    state after num_timesteps steps (aliased with the x input)
    """
    inv_sqrt2 = jnp.float32(1.0 / math.sqrt(2.0))

    def sheet_step(x_bf16):
        # Re-read W from VMEM each step (vld slots are idle; keeps the 8-vreg
        # weight rematerializable instead of pinned across the unrolled loop).
        # bf16 MXU operands, f32 accumulation.
        h = jnp.dot(w_ref[...], x_bf16, preferred_element_type=jnp.float32)
        # (1, N) bias added along the LAST axis, reproducing the PyTorch
        # `output += self.bias` broadcast.  The sublane-broadcast is folded
        # into the add — no (N, B) f32 broadcast is kept live.
        h = h + b_ref[...]
        # torch.nn.GELU() default = exact erf formulation; elementwise in f32.
        # TODO(synk): tanh-approx GELU would move this onto the EUP slot but
        # deviates from the exact-erf default, so it is not applied here.
        return 0.5 * h * (1.0 + lax.erf(h * inv_sqrt2))

    if num_timesteps == 0:
        o_ref[...] = x_ref[...]
        return

    # bf16 recurrent carry (8 vregs vs 16 for f32).  The matmul sees exactly
    # the same bf16 values as the mixed-precision reference (the cast is just
    # moved from the top of step k+1 to the bottom of step k).
    x = x_ref[...].astype(jnp.bfloat16)
    if num_timesteps > 1:
        x = lax.fori_loop(
            0, num_timesteps - 1,
            lambda _, xc: sheet_step(xc).astype(jnp.bfloat16),
            x, unroll=True)
    # Last step peeled: final GELU output stays f32 (no extra bf16 rounding).
    o_ref[...] = sheet_step(x)


def prepare_cortical_rnn_params(w, bias):
    """One-time (init-time) parameter preprocessing.

    Hoists the bf16 weight cast and the (1, N) bias reshape out of the
    per-call forward so no extra convert/reshape XLA ops run per forward.
    bf16 W also halves the HBM->VMEM DMA and the resident VMEM footprint.
    """
    n = w.shape[0]
    return w.astype(jnp.bfloat16), bias.reshape(1, n).astype(jnp.float32)


@functools.partial(jax.jit, static_argnames=("num_timesteps",))
def cortical_rnn_forward(w_bf16, bias_2d, x, num_timesteps):
    n, batch = x.shape
    assert w_bf16.shape == (n, n) and bias_2d.shape == (1, n)
    # The PyTorch `output += self.bias` broadcast only type-checks when
    # batch == num_neurons; keep that constraint (it also blocks the wide-batch
    # / multi-TensorCore restructuring — single sequence only).
    assert batch == n

    kernel = functools.partial(_cortical_rnn_kernel, num_timesteps=num_timesteps)
    vmem = lambda: pl.BlockSpec(memory_space=pltpu.MemorySpace.VMEM)
    # Grid-less: ~0.13 MiB of operands fits trivially in VMEM in one shot, so
    # there is no per-grid-step pipeline setup.
    # Scaling guard: the resident bf16 W is 2*N^2 bytes — it exceeds the
    # default scoped-VMEM limit around N≈2.9k (v5e, 16 MiB) / N≈4k (v6e/v7x,
    # 32 MiB) and v7x's 64 MiB physical VMEM around N≈5.8k.  Before scaling N,
    # raise pltpu.CompilerParams(vmem_limit_bytes=...) or move to a K-tiled
    # grid with an f32 accumulator scratch.
    return pl.pallas_call(
        kernel,
        out_shape=jax.ShapeDtypeStruct((n, batch), jnp.float32),
        in_specs=[vmem(), vmem(), vmem()],
        out_specs=vmem(),
        # Recurrent state updated in place: alias x (input 2) with output 0.
        input_output_aliases={2: 0},
    )(w_bf16, bias_2d, x.astype(jnp.float32))


def build_cortical_sheet_weight(key, num_neurons, synapses_per_neuron):
    """Deterministic synthetic init mirroring CorticalSheet.__init__.

    For neuron i: random presynaptic indices -> COO entries (syn, i) with
    normal values; duplicates are summed (== .coalesce()). Returned dense.
    """
    k_idx, k_val = jax.random.split(key)
    nnz = num_neurons * synapses_per_neuron
    rows = jax.random.randint(k_idx, (nnz,), 0, num_neurons)          # synapses
    cols = jnp.repeat(jnp.arange(num_neurons), synapses_per_neuron)   # synapse_root
    vals = jax.random.normal(k_val, (nnz,), jnp.float32)
    w = jnp.zeros((num_neurons, num_neurons), jnp.float32).at[rows, cols].add(vals)
    bias = jnp.zeros((num_neurons,), jnp.float32)
    return w, bias


def reference_forward_mixed(w, bias, x, num_timesteps):
    """Pure-JAX reference with the SAME precision policy as the kernel
    (bf16 matmul operands, f32 accumulation, f32 elementwise)."""
    w_bf = w.astype(jnp.bfloat16)
    inv_sqrt2 = 1.0 / math.sqrt(2.0)
    for _ in range(num_timesteps):
        h = jnp.dot(w_bf, x.astype(jnp.bfloat16),
                    preferred_element_type=jnp.float32) + bias
        x = 0.5 * h * (1.0 + lax.erf(h * inv_sqrt2))
    return x


def reference_forward_f32(w, bias, x, num_timesteps):
    """Full-f32 reference (matches the PyTorch module's dtype)."""
    inv_sqrt2 = 1.0 / math.sqrt(2.0)
    for _ in range(num_timesteps):
        h = w @ x + bias  # bias broadcast along last axis (as in the PyTorch code)
        x = 0.5 * h * (1.0 + lax.erf(h * inv_sqrt2))
    return x


if __name__ == "__main__":
    key = jax.random.PRNGKey(0)
    k_w, k_x = jax.random.split(key)

    w, bias = build_cortical_sheet_weight(k_w, NUM_NEURONS, SYNAPSES_PER_NEURON)
    x = jax.random.normal(k_x, (NUM_NEURONS, BATCH), jnp.float32)

    # One-time parameter prep (weight cast / bias reshape hoisted out of the
    # per-call forward).
    w_bf16, bias_2d = prepare_cortical_rnn_params(w, bias)
    w_bf16 = jax.block_until_ready(w_bf16)
    bias_2d = jax.block_until_ready(bias_2d)

    ref_mixed = jax.block_until_ready(
        reference_forward_mixed(w, bias, x, NUM_TIMESTEPS))
    ref_f32 = jax.block_until_ready(
        reference_forward_f32(w, bias, x, NUM_TIMESTEPS))

    out = jax.block_until_ready(
        cortical_rnn_forward(w_bf16, bias_2d, x, NUM_TIMESTEPS))
    assert out.shape == (NUM_NEURONS, BATCH)

    # 1) Kernel must tightly match the pure-JAX implementation of the same
    #    (bf16-operand, f32-accumulate) math.
    assert jnp.allclose(out, ref_mixed, rtol=1e-3, atol=1e-2), float(
        jnp.max(jnp.abs(out - ref_mixed)))

    # 2) bf16 MXU operands drift slightly vs. the all-f32 reference across the
    #    unnormalized (magnitude-growing) 4-step recurrence; bound the drift
    #    relative to the overall output scale.
    scale = float(jnp.max(jnp.abs(ref_f32))) + 1e-6
    drift = float(jnp.max(jnp.abs(out - ref_f32))) / scale
    assert drift < 0.1, drift

    print("KERNEL_OK")
</pallas_src>

<mosaic_0001>
module attributes {stable_mosaic.version = 11 : i64} {
  func.func @_cortical_rnn_kernel(%arg0: memref<128x128xbf16, #tpu.memory_space<vmem>>, %arg1: memref<1x128xf32, #tpu.memory_space<vmem>>, %arg2: memref<128x128xf32, #tpu.memory_space<vmem>>, %arg3: memref<128x128xf32, #tpu.memory_space<vmem>>) attributes {dimension_semantics = [], scalar_prefetch = 0 : i64, scratch_operands = 0 : i64, tpu.core_type = #tpu.core_type<tc>} {
    %c0 = arith.constant 0 : index
    %c0_0 = arith.constant 0 : index
    %0 = vector.load %arg2[%c0, %c0_0] : memref<128x128xf32, #tpu.memory_space<vmem>>, vector<128x128xf32>
    %1 = arith.truncf %0 : vector<128x128xf32> to vector<128x128xbf16>
    %cst = arith.constant 0.707106769 : f32
    %c0_i32 = arith.constant 0 : i32
    %c0_1 = arith.constant 0 : index
    %c0_2 = arith.constant 0 : index
    %2 = vector.load %arg0[%c0_1, %c0_2] : memref<128x128xbf16, #tpu.memory_space<vmem>>, vector<128x128xbf16>
    %cst_3 = arith.constant dense<0.000000e+00> : vector<128x128xf32>
    %3 = tpu.matmul %2, %1, %cst_3 {dimension_numbers = #tpu.dot_dimension_numbers<[1], [0], [0], [1], [0, 0, 1, 1], [], []>} : vector<128x128xbf16>, vector<128x128xbf16>, vector<128x128xf32> -> vector<128x128xf32>
    %c0_4 = arith.constant 0 : index
    %c0_5 = arith.constant 0 : index
    %4 = vector.load %arg1[%c0_4, %c0_5] : memref<1x128xf32, #tpu.memory_space<vmem>>, vector<1x128xf32>
    %5 = vector.broadcast %4 : vector<1x128xf32> to vector<128x128xf32>
    %6 = arith.addf %3, %5 : vector<128x128xf32>
    %cst_6 = arith.constant 5.000000e-01 : f32
    %7 = vector.broadcast %cst_6 : f32 to vector<128x128xf32>
    %8 = arith.mulf %7, %6 : vector<128x128xf32>
    %9 = vector.broadcast %cst : f32 to vector<128x128xf32>
    %10 = arith.mulf %6, %9 : vector<128x128xf32>
    %11 = math.erf %10 : vector<128x128xf32>
    %cst_7 = arith.constant 1.000000e+00 : f32
    %12 = vector.broadcast %cst_7 : f32 to vector<128x128xf32>
    %13 = arith.addf %12, %11 : vector<128x128xf32>
    %14 = arith.mulf %8, %13 : vector<128x128xf32>
    %15 = arith.truncf %14 : vector<128x128xf32> to vector<128x128xbf16>
    %c1_i32 = arith.constant 1 : i32
    %c0_8 = arith.constant 0 : index
    %c0_9 = arith.constant 0 : index
    %16 = vector.load %arg0[%c0_8, %c0_9] : memref<128x128xbf16, #tpu.memory_space<vmem>>, vector<128x128xbf16>
    %cst_10 = arith.constant dense<0.000000e+00> : vector<128x128xf32>
    %17 = tpu.matmul %16, %15, %cst_10 {dimension_numbers = #tpu.dot_dimension_numbers<[1], [0], [0], [1], [0, 0, 1, 1], [], []>} : vector<128x128xbf16>, vector<128x128xbf16>, vector<128x128xf32> -> vector<128x128xf32>
    %c0_11 = arith.constant 0 : index
    %c0_12 = arith.constant 0 : index
    %18 = vector.load %arg1[%c0_11, %c0_12] : memref<1x128xf32, #tpu.memory_space<vmem>>, vector<1x128xf32>
    %19 = vector.broadcast %18 : vector<1x128xf32> to vector<128x128xf32>
    %20 = arith.addf %17, %19 : vector<128x128xf32>
    %cst_13 = arith.constant 5.000000e-01 : f32
    %21 = vector.broadcast %cst_13 : f32 to vector<128x128xf32>
    %22 = arith.mulf %21, %20 : vector<128x128xf32>
    %23 = vector.broadcast %cst : f32 to vector<128x128xf32>
    %24 = arith.mulf %20, %23 : vector<128x128xf32>
    %25 = math.erf %24 : vector<128x128xf32>
    %cst_14 = arith.constant 1.000000e+00 : f32
    %26 = vector.broadcast %cst_14 : f32 to vector<128x128xf32>
    %27 = arith.addf %26, %25 : vector<128x128xf32>
    %28 = arith.mulf %22, %27 : vector<128x128xf32>
    %29 = arith.truncf %28 : vector<128x128xf32> to vector<128x128xbf16>
    %c2_i32 = arith.constant 2 : i32
    %c0_15 = arith.constant 0 : index
    %c0_16 = arith.constant 0 : index
    %30 = vector.load %arg0[%c0_15, %c0_16] : memref<128x128xbf16, #tpu.memory_space<vmem>>, vector<128x128xbf16>
    %cst_17 = arith.constant dense<0.000000e+00> : vector<128x128xf32>
    %31 = tpu.matmul %30, %29, %cst_17 {dimension_numbers = #tpu.dot_dimension_numbers<[1], [0], [0], [1], [0, 0, 1, 1], [], []>} : vector<128x128xbf16>, vector<128x128xbf16>, vector<128x128xf32> -> vector<128x128xf32>
    %c0_18 = arith.constant 0 : index
    %c0_19 = arith.constant 0 : index
    %32 = vector.load %arg1[%c0_18, %c0_19] : memref<1x128xf32, #tpu.memory_space<vmem>>, vector<1x128xf32>
    %33 = vector.broadcast %32 : vector<1x128xf32> to vector<128x128xf32>
    %34 = arith.addf %31, %33 : vector<128x128xf32>
    %cst_20 = arith.constant 5.000000e-01 : f32
    %35 = vector.broadcast %cst_20 : f32 to vector<128x128xf32>
    %36 = arith.mulf %35, %34 : vector<128x128xf32>
    %37 = vector.broadcast %cst : f32 to vector<128x128xf32>
    %38 = arith.mulf %34, %37 : vector<128x128xf32>
    %39 = math.erf %38 : vector<128x128xf32>
    %cst_21 = arith.constant 1.000000e+00 : f32
    %40 = vector.broadcast %cst_21 : f32 to vector<128x128xf32>
    %41 = arith.addf %40, %39 : vector<128x128xf32>
    %42 = arith.mulf %36, %41 : vector<128x128xf32>
    %43 = arith.truncf %42 : vector<128x128xf32> to vector<128x128xbf16>
    %c0_22 = arith.constant 0 : index
    %c0_23 = arith.constant 0 : index
    %44 = vector.load %arg0[%c0_22, %c0_23] : memref<128x128xbf16, #tpu.memory_space<vmem>>, vector<128x128xbf16>
    %cst_24 = arith.constant dense<0.000000e+00> : vector<128x128xf32>
    %45 = tpu.matmul %44, %43, %cst_24 {dimension_numbers = #tpu.dot_dimension_numbers<[1], [0], [0], [1], [0, 0, 1, 1], [], []>} : vector<128x128xbf16>, vector<128x128xbf16>, vector<128x128xf32> -> vector<128x128xf32>
    %c0_25 = arith.constant 0 : index
    %c0_26 = arith.constant 0 : index
    %46 = vector.load %arg1[%c0_25, %c0_26] : memref<1x128xf32, #tpu.memory_space<vmem>>, vector<1x128xf32>
    %47 = vector.broadcast %46 : vector<1x128xf32> to vector<128x128xf32>
    %48 = arith.addf %45, %47 : vector<128x128xf32>
    %cst_27 = arith.constant 5.000000e-01 : f32
    %49 = vector.broadcast %cst_27 : f32 to vector<128x128xf32>
    %50 = arith.mulf %49, %48 : vector<128x128xf32>
    %cst_28 = arith.constant 0.707106769 : f32
    %51 = vector.broadcast %cst_28 : f32 to vector<128x128xf32>
    %52 = arith.mulf %48, %51 : vector<128x128xf32>
    %53 = math.erf %52 : vector<128x128xf32>
    %cst_29 = arith.constant 1.000000e+00 : f32
    %54 = vector.broadcast %cst_29 : f32 to vector<128x128xf32>
    %55 = arith.addf %54, %53 : vector<128x128xf32>
    %56 = arith.mulf %50, %55 : vector<128x128xf32>
    %c0_30 = arith.constant 0 : index
    %c0_31 = arith.constant 0 : index
    %57 = vector.load %arg3[%c0_30, %c0_31] : memref<128x128xf32, #tpu.memory_space<vmem>>, vector<128x128xf32>
    tpu.vector_store %arg3[%c0_30, %c0_31], %56 {strides = array<i32>} : memref<128x128xf32, #tpu.memory_space<vmem>>, vector<128x128xf32>,
    return
  }
}

</mosaic_0001>

<bundles_post_ra>
// kernel: cortical_rnn_forward.1
= control target key start
LH: loop header
LB: loop body
LE: loop exit
PB: predicated region body
PF: predicated region fallthrough
CT: control target
= control target key end

     0   :  { %8 = vsyncpa [#allocation3], 0  ;;  %s1614_s0 = inlined_call_operand.vmem [shape: bf16[128,128], index: 0, kind: input, shape index: {}]   ;;  %s1615_s1 = inlined_call_operand.vmem [shape: f32[1,128], index: 1, kind: input, shape index: {}]   ;;  %s1616_s2 = inlined_call_operand.hbm [shape: f32[128,128], index: 2, kind: input, shape index: {}, may-alias: {2,3}]   ;;  %s1617_s3 = inlined_call_operand.hbm [shape: f32[128,128], index: 3, kind: output, shape index: {}, may-alias: {2,3}]  }
   0x1   :  { %9 = vsyncpa [#allocation4], 0  ;;  %s1276_s12 = smov [#allocation2]  }
   0x2   :  { %s19_s13 = sshll.u32 %s1276_s12, 4  ;;  %s20_s13 = int_to_ptr.vmem [resolvable:$true] %s19_s13 }
   0x3   :  { %s1240_s14 = scalar_lea.vmem %s20_s13, 2048  ;;  %p1245_p1 = scmp.lt.s32.totalorder %s20_s13, %s20_s13 }
   0x4   :  { %p1241_p0 = scmp.ne.s32.totalorder %s20_s13, %s1240_s14  ;;  %p1246_p2 = scmp.lt.s32.totalorder %s1240_s14, %s1240_s14 }
   0x6   :  { %p1247_p3 = por %p1246_p2, %p1245_p1 }
   0x8   :  { %p1248_p4 = pnand %p1247_p3, %p1241_p0 }
   0xa   :  { %1251 = shalt.err (!%p1248_p4)
}
   0xb   :  { %s1277_s15 = smov 128   ;;  %s1278_s16 = smov 8  }
   0xc   :  { %25 = dma.hbm_to_vmem [thread:$0]  %s1616_s2, 2048, %s20_s13, [#allocation3], %s1277_s15, %s1277_s15, %s1278_s16  }
   0xd   :  { %1272 = dma.done.wait [#allocation3], 2048  }
   0xe   :  { %1273 = vsyncadd [#allocation3], 4294965248  ;;  %v44_v0 = vld [vmem:[#allocation2 + $0x70] sm:$0xff]  ;;  %v45_v1 = vld [vmem:[#allocation2 + $0x78] sm:$0xff] }
   0xf   :  { %v42_v2 = vld [vmem:[#allocation2 + $0x60] sm:$0xff]  ;;  %v53_v3 = vpack.c.bf16 %v45_v1, %v44_v0  ;;  %v43_v4 = vld [vmem:[#allocation2 + $0x68] sm:$0xff]  ;;  %v40_v6 = vld [vmem:[#allocation2 + $0x50] sm:$0xff] }
  0x10   :  { %v52_v5 = vpack.c.bf16 %v43_v4, %v42_v2  ;;  %v41_v7 = vld [vmem:[#allocation2 + $0x58] sm:$0xff]  ;;  %v38_v8 = vld [vmem:[#allocation2 + $0x40] sm:$0xff]  ;;  %v39_v10 = vld [vmem:[#allocation2 + $0x48] sm:$0xff] }
  0x11   :  { %963 = vmatprep.subr.bf16.mxu0 %v53_v3  ;;  %v51_v9 = vpack.c.bf16 %v41_v7, %v40_v6  ;;  %v1309_v11 = vld [vmem:[%s1614_s0] sm:$0xff]   ;;  %v50_v12 = vpack.c.bf16 %v39_v10, %v38_v8  ;;  %v36_v13 = vld [vmem:[#allocation2 + $0x30] sm:$0xff]  ;;  %v37_v14 = vld [vmem:[#allocation2 + $0x38] sm:$0xff] }
  0x12   :  { %964 = vmatpush3.bf16.msra.mxu0 %v53_v3  ;;  %979 = vmatprep.mubr.bf16.mxu0 %v1309_v11  ;;  %v49_v15 = vpack.c.bf16 %v37_v14, %v36_v13  ;;  %v34_v16 = vld [vmem:[#allocation2 + $0x20] sm:$0xff]  ;;  %v35_v17 = vld [vmem:[#allocation2 + $0x28] sm:$0xff]  ;;  %v32_v19 = vld [vmem:[#allocation2 + $0x10] sm:$0xff] }
  0x13   :  { %965 = vmatprep.subr.bf16.mxu0 %v52_v5  ;;  %1011 = vmatprep.mubr.bf16.mxu1 %v1309_v11  ;;  %v48_v18 = vpack.c.bf16 %v35_v17, %v34_v16  ;;  %v33_v20 = vld [vmem:[#allocation2 + $0x18] sm:$0xff]  ;;  %v30_v22 = vld [vmem:[#allocation2] sm:$0xff]  ;;  %v31_v23 = vld [vmem:[#allocation2 + $0x8] sm:$0xff] }
  0x14   :  { %v47_v21 = vpack.c.bf16 %v33_v20, %v32_v19  ;;  %v46_v24 = vpack.c.bf16 %v31_v23, %v30_v22  ;;  %v1316_v25 = vld [vmem:[%s1614_s0 + $0x8] sm:$0xff]   ;;  %v1321_v26 = vld [vmem:[%s1614_s0 + $0x10] sm:$0xff]   ;;  %v1328_v27 = vld [vmem:[%s1614_s0 + $0x18] sm:$0xff]  }
  0x15   :  { %v1333_v28 = vld [vmem:[%s1614_s0 + $0x20] sm:$0xff]   ;;  %v1340_v29 = vld [vmem:[%s1614_s0 + $0x28] sm:$0xff]   ;;  %v1345_v30 = vld [vmem:[%s1614_s0 + $0x30] sm:$0xff]  }
  0x16   :  { %966 = vmatpush3.bf16.msra.mxu0 %v52_v5  ;;  %v1352_v31 = vld [vmem:[%s1614_s0 + $0x38] sm:$0xff]   ;;  %v1359_v43 = vld [vmem:[%s1615_s1] ss:$0 sm:$0xff] }
  0x17   :  { %967 = vmatprep.subr.bf16.mxu0 %v51_v9 }
  0x1a   :  { %968 = vmatpush3.bf16.msra.mxu0 %v51_v9 }
  0x1b   :  { %969 = vmatprep.subr.bf16.mxu0 %v50_v12 }
  0x1e   :  { %970 = vmatpush3.bf16.msra.mxu0 %v50_v12 }
  0x1f   :  { %971 = vmatprep.subr.bf16.mxu0 %v49_v15 }
  0x22   :  { %972 = vmatpush3.bf16.msra.mxu0 %v49_v15 }
  0x23   :  { %973 = vmatprep.subr.bf16.mxu0 %v48_v18 }
  0x26   :  { %974 = vmatpush3.bf16.msra.mxu0 %v48_v18 }
  0x27   :  { %975 = vmatprep.subr.bf16.mxu0 %v47_v21 }
  0x2a   :  { %976 = vmatpush3.bf16.msra.mxu0 %v47_v21 }
  0x2b   :  { %977 = vmatprep.subr.bf16.mxu0 %v46_v24 }
  0x2e   :  { %978 = vmatpush3.bf16.msra.mxu0 %v46_v24 }
  0x31   :  { %980 = vmatmul.mubr.bf16.vlgmr.msra.gmra.mxu0 %v1316_v25 }
  0x32   :  { %983 = vmatprep.mubr.bf16.mxu0 %v1321_v26 }
  0x39   :  { %984 = vmatmul.mubr.bf16.gmra.mxu0 %v1328_v27 }
  0x3a   :  { %987 = vmatprep.mubr.bf16.mxu0 %v1333_v28 }
  0x41   :  { %988 = vmatmul.mubr.bf16.gmra.mxu0 %v1340_v29 }
  0x42   :  { %991 = vmatprep.mubr.bf16.mxu0 %v1345_v30 }
  0x49   :  { %992 = vmatmul.mubr.bf16.gmra.mxu0 %v1352_v31 }
  0x4a   :  { %1043 = vmatprep.mubr.bf16.mxu0 %v1309_v11 }
  0xf1   :  { %v981_v32 = vpop.f32.mrf.mxu0 }
  0xf2   :  { %v1400_v10 = vadd.f32 %v981_v32, %v1359_v43 }
  0xf3   :  { %v159_v33 = vpop.f32.mrf.mxu0 }
  0xf4   :  { %v240_v19 = vmul.f32 0.70710677, %v1400_v10  ;;  %v1409_v20 = vadd.f32 %v1359_v43, %v159_v33 }
  0xf5   :  { %v982_v34 = vpop.f32.mrf.mxu0 }
  0xf6   :  { %v1396_v7 = vadd.f32 %v982_v34, %v1359_v43  ;;  %v238_v33 = vmul.f32 0.70710677, %v1409_v20 }
  0xf7   :  { %v162_v35 = vpop.f32.mrf.mxu0 }
  0xf8   :  { %v241_v14 = vmul.f32 0.70710677, %v1396_v7  ;;  %v1405_v16 = vadd.f32 %v1359_v43, %v162_v35 }
  0xf9   :  { %v985_v36 = vpop.f32.mrf.mxu0 }
  0xfa   :  { %v1384_v1 = vadd.f32 %v985_v36, %v1359_v43  ;;  %v239_v36 = vmul.f32 0.70710677, %v1405_v16 }
  0xfb   :  { %v175_v37 = vpop.f32.mrf.mxu0 }
  0xfc   :  { %v244_v5 = vmul.f32 0.70710677, %v1384_v1  ;;  %v1393_v6 = vadd.f32 %v1359_v43, %v175_v37 }
  0xfd   :  { %v986_v38 = vpop.f32.mrf.mxu0 }
  0xfe   :  { %v1380_v62 = vadd.f32 %v986_v38, %v1359_v43  ;;  %v242_v12 = vmul.f32 0.70710677, %v1393_v6 }
  0xff   :  { %v178_v39 = vpop.f32.mrf.mxu0 }
 0x100   :  { %v245_v3 = vmul.f32 0.70710677, %v1380_v62  ;;  %v1389_v4 = vadd.f32 %v1359_v43, %v178_v39 }
 0x101   :  { %v989_v40 = vpop.f32.mrf.mxu0 }
 0x102   :  { %v1366_v49 = vadd.f32 %v989_v40, %v1359_v43  ;;  %v243_v8 = vmul.f32 0.70710677, %v1389_v4 }
 0x103   :  { %v191_v41 = vpop.f32.mrf.mxu0 }
 0x104   :  { %v248_v58 = vmul.f32 0.70710677, %v1366_v49  ;;  %v1376_v59 = vadd.f32 %v1359_v43, %v191_v41 }
 0x105   :  { %v990_v42 = vpop.f32.mrf.mxu0 }
 0x106   :  { %v1362_v45 = vadd.f32 %v990_v42, %v1359_v43  ;;  %v246_v2 = vmul.f32 0.70710677, %v1376_v59 }
 0x107   :  { %v194_v44 = vpop.f32.mrf.mxu0 }
 0x108   :  { %v249_v50 = vmul.f32 0.70710677, %v1362_v45  ;;  %v1371_v54 = vadd.f32 %v1359_v43, %v194_v44 }
 0x109   :  { %v993_v46 = vpop.f32.mrf.mxu0 }
 0x10a   :  { %v216_v47 = vadd.f32 %v993_v46, %v1359_v43  ;;  %v247_v63 = vmul.f32 0.70710677, %v1371_v54  ;;  %v233_v46 = vmul.f32 0.5, %v1362_v45 }
 0x10b   :  { %v207_v48 = vpop.f32.mrf.mxu0 }
 0x10c   :  { %v252_v51 = vmul.f32 0.70710677, %v216_v47  ;;  %v208_v52 = vadd.f32 %v1359_v43, %v207_v48  ;;  %v236_v21 = vmul.f32 0.5, %v216_v47 }
 0x10d   :  { %v994_v53 = vpop.f32.mrf.mxu0 }
 0x10e   :  { %1103 = verf.f32 %v252_v51  ;;  %v219_v55 = vadd.f32 %v994_v53, %v1359_v43  ;;  %v250_v56 = vmul.f32 0.70710677, %v208_v52  ;;  %v234_v40 = vmul.f32 0.5, %v208_v52 }
 0x10f   :  { %v210_v57 = vpop.f32.mrf.mxu0  ;;  %1105 = verf.f32 %v249_v50  ;;  %v232_v53 = vmul.f32 0.5, %v1366_v49 }
 0x110   :  { %v253_v60 = vmul.f32 0.70710677, %v219_v55  ;;  %1107 = verf.f32 %v250_v56  ;;  %v211_v61 = vadd.f32 %v1359_v43, %v210_v57  ;;  %v237_v22 = vmul.f32 0.5, %v219_v55 }
 0x112   :  { %1109 = verf.f32 %v253_v60  ;;  %v251_v0 = vmul.f32 0.70710677, %v211_v61  ;;  %v235_v41 = vmul.f32 0.5, %v211_v61  ;;  %v231_v61 = vmul.f32 0.5, %v1371_v54 }
 0x113   :  { %1111 = verf.f32 %v248_v58 }
 0x114   :  { %1113 = verf.f32 %v251_v0  ;;  %v230_v0 = vmul.f32 0.5, %v1376_v59 }
 0x115   :  { %1115 = verf.f32 %v247_v63 }
 0x116   :  { %1117 = verf.f32 %v246_v2 }
 0x117   :  { %1119 = verf.f32 %v245_v3 }
 0x118   :  { %1121 = verf.f32 %v244_v5 }
 0x119   :  { %1123 = verf.f32 %v243_v8  ;;  %v229_v8 = vmul.f32 0.5, %v1380_v62 }
 0x11a   :  { %1125 = verf.f32 %v242_v12 }
 0x11b   :  { %v1104_v9 = vpop.eup %1103  ;;  %1127 = verf.f32 %v241_v14  ;;  %v228_v14 = vmul.f32 0.5, %v1384_v1  ;;  %v225_v1 = vmul.f32 0.5, %v1396_v7 }
 0x11c   :  { %v1106_v13 = vpop.eup %1105  ;;  %v284_v17 = vadd.f32 1.0, %v1104_v9  ;;  %1129 = verf.f32 %v240_v19 }
 0x11d   :  { %v1108_v15 = vpop.eup %1107  ;;  %v281_v35 = vadd.f32 1.0, %v1106_v13  ;;  %1131 = verf.f32 %v239_v36 }
 0x11e   :  { %v282_v32 = vadd.f32 1.0, %v1108_v15  ;;  %v300_v37 = vmul.f32 %v284_v17, %v236_v21  ;;  %1133 = verf.f32 %v238_v33  ;;  %v227_v21 = vmul.f32 0.5, %v1389_v4 }
 0x11f   :  { %v1110_v18 = vpop.eup %1109  ;;  %v297_v55 = vmul.f32 %v281_v35, %v233_v46 }
 0x120   :  { %v285_v23 = vadd.f32 1.0, %v1110_v18  ;;  %v1112_v24 = vpop.eup %1111  ;;  %v298_v50 = vmul.f32 %v282_v32, %v234_v40 }
 0x121   :  { %v1114_v34 = vpop.eup %1113  ;;  %v280_v44 = vadd.f32 1.0, %v1112_v24 }
 0x122   :  { %v301_v38 = vmul.f32 %v285_v23, %v237_v22  ;;  %v1116_v39 = vpop.eup %1115  ;;  %v283_v42 = vadd.f32 1.0, %v1114_v34  ;;  %v226_v23 = vmul.f32 0.5, %v1393_v6  ;;  %v223_v6 = vmul.f32 0.5, %v1405_v16 }
 0x123   :  { %v1118_v48 = vpop.eup %1117  ;;  %v279_v56 = vadd.f32 1.0, %v1116_v39  ;;  %v296_v58 = vmul.f32 %v280_v44, %v232_v53 }
 0x124   :  { %v309_v47 = vpack.c.bf16 %v301_v38, %v300_v37  ;;  %v299_v51 = vmul.f32 %v283_v42, %v235_v41  ;;  %v1120_v57 = vpop.eup %1119  ;;  %v278_v60 = vadd.f32 1.0, %v1118_v48  ;;  %v224_v37 = vmul.f32 0.5, %v1400_v10 }
 0x125   :  { %v1122_v63 = vpop.eup %1121  ;;  %v277_v45 = vadd.f32 1.0, %v1120_v57  ;;  %v295_v2 = vmul.f32 %v279_v56, %v231_v61  ;;  %v307_v3 = vpack.c.bf16 %v297_v55, %v296_v58  ;;  %v222_v42 = vmul.f32 0.5, %v1409_v20 }
 0x126   :  { %995 = vmatprep.subr.bf16.mxu1 %v309_v47  ;;  %v308_v52 = vpack.c.bf16 %v299_v51, %v298_v50  ;;  %v1124_v5 = vpop.eup %1123  ;;  %v276_v49 = vadd.f32 1.0, %v1122_v63  ;;  %v294_v9 = vmul.f32 %v278_v60, %v230_v0 }
 0x127   :  { %996 = vmatpush3.bf16.msra.mxu1 %v309_v47  ;;  %v1126_v12 = vpop.eup %1125  ;;  %v293_v15 = vmul.f32 %v277_v45, %v229_v8  ;;  %v275_v54 = vadd.f32 1.0, %v1124_v5 }
 0x128   :  { %997 = vmatprep.subr.bf16.mxu1 %v308_v52  ;;  %v1128_v13 = vpop.eup %1127  ;;  %v306_v17 = vpack.c.bf16 %v295_v2, %v294_v9  ;;  %v292_v19 = vmul.f32 %v276_v49, %v228_v14  ;;  %v274_v59 = vadd.f32 1.0, %v1126_v12 }
 0x129   :  { %v1130_v18 = vpop.eup %1129  ;;  %v273_v22 = vadd.f32 1.0, %v1128_v13  ;;  %v291_v62 = vmul.f32 %v275_v54, %v227_v21 }
 0x12a   :  { %v305_v24 = vpack.c.bf16 %v293_v15, %v292_v19  ;;  %v1132_v32 = vpop.eup %1131  ;;  %v272_v34 = vadd.f32 1.0, %v1130_v18  ;;  %v290_v36 = vmul.f32 %v274_v59, %v226_v23 }
 0x12b   :  { %998 = vmatpush3.bf16.msra.mxu1 %v308_v52  ;;  %v1134_v35 = vpop.eup %1133  ;;  %v289_v38 = vmul.f32 %v273_v22, %v225_v1  ;;  %v271_v39 = vadd.f32 1.0, %v1132_v32 }
 0x12c   :  { %999 = vmatprep.subr.bf16.mxu1 %v307_v3  ;;  %v304_v40 = vpack.c.bf16 %v291_v62, %v290_v36  ;;  %v288_v4 = vmul.f32 %v272_v34, %v224_v37  ;;  %v270_v41 = vadd.f32 1.0, %v1134_v35 }
 0x12d   :  { %v287_v33 = vmul.f32 %v271_v39, %v223_v6 }
 0x12e   :  { %v303_v44 = vpack.c.bf16 %v289_v38, %v288_v4  ;;  %v286_v7 = vmul.f32 %v270_v41, %v222_v42 }
 0x12f   :  { %1000 = vmatpush3.bf16.msra.mxu1 %v307_v3 }
 0x130   :  { %1001 = vmatprep.subr.bf16.mxu1 %v306_v17  ;;  %v302_v46 = vpack.c.bf16 %v287_v33, %v286_v7 }
 0x133   :  { %1002 = vmatpush3.bf16.msra.mxu1 %v306_v17 }
 0x134   :  { %1003 = vmatprep.subr.bf16.mxu1 %v305_v24 }
 0x137   :  { %1004 = vmatpush3.bf16.msra.mxu1 %v305_v24 }
 0x138   :  { %1005 = vmatprep.subr.bf16.mxu1 %v304_v40 }
 0x13b   :  { %1006 = vmatpush3.bf16.msra.mxu1 %v304_v40 }
 0x13c   :  { %1007 = vmatprep.subr.bf16.mxu1 %v303_v44 }
 0x13f   :  { %1008 = vmatpush3.bf16.msra.mxu1 %v303_v44 }
 0x140   :  { %1009 = vmatprep.subr.bf16.mxu1 %v302_v46 }
 0x143   :  { %1010 = vmatpush3.bf16.msra.mxu1 %v302_v46 }
 0x146   :  { %1012 = vmatmul.mubr.bf16.vlgmr.msra.gmra.mxu1 %v1316_v25 }
 0x147   :  { %1015 = vmatprep.mubr.bf16.mxu1 %v1321_v26 }
 0x14e   :  { %1016 = vmatmul.mubr.bf16.gmra.mxu1 %v1328_v27 }
 0x14f   :  { %1019 = vmatprep.mubr.bf16.mxu1 %v1333_v28 }
 0x156   :  { %1020 = vmatmul.mubr.bf16.gmra.mxu1 %v1340_v29 }
 0x157   :  { %1023 = vmatprep.mubr.bf16.mxu1 %v1345_v30 }
 0x15e   :  { %1024 = vmatmul.mubr.bf16.gmra.mxu1 %v1352_v31 }
 0x15f   :  { %1075 = vmatprep.mubr.bf16.mxu1 %v1309_v11 }
 0x206   :  { %v1013_v10 = vpop.f32.mrf.mxu1 }
 0x207   :  { %v1472_v1 = vadd.f32 %v1013_v10, %v1359_v43 }
 0x208   :  { %v344_v16 = vpop.f32.mrf.mxu1 }
 0x209   :  { %v425_v41 = vmul.f32 0.70710677, %v1472_v1  ;;  %v1481_v6 = vadd.f32 %v1359_v43, %v344_v16 }
 0x20a   :  { %v1014_v20 = vpop.f32.mrf.mxu1 }
 0x20b   :  { %v1468_v24 = vadd.f32 %v1014_v20, %v1359_v43  ;;  %v423_v16 = vmul.f32 0.70710677, %v1481_v6 }
 0x20c   :  { %v347_v47 = vpop.f32.mrf.mxu1 }
 0x20d   :  { %v426_v37 = vmul.f32 0.70710677, %v1468_v24  ;;  %v1477_v39 = vadd.f32 %v1359_v43, %v347_v47 }
 0x20e   :  { %v1017_v48 = vpop.f32.mrf.mxu1 }
 0x20f   :  { %v1456_v19 = vadd.f32 %v1017_v48, %v1359_v43  ;;  %v424_v20 = vmul.f32 0.70710677, %v1477_v39 }
 0x210   :  { %v360_v50 = vpop.f32.mrf.mxu1 }
 0x211   :  { %v429_v23 = vmul.f32 0.70710677, %v1456_v19  ;;  %v1465_v62 = vadd.f32 %v1359_v43, %v360_v50 }
 0x212   :  { %v1018_v51 = vpop.f32.mrf.mxu1 }
 0x213   :  { %v1452_v54 = vadd.f32 %v1018_v51, %v1359_v43  ;;  %v427_v36 = vmul.f32 0.70710677, %v1465_v62 }
 0x214   :  { %v363_v53 = vpop.f32.mrf.mxu1 }
 0x215   :  { %v430_v21 = vmul.f32 0.70710677, %v1452_v54  ;;  %v1461_v22 = vadd.f32 %v1359_v43, %v363_v53 }
 0x216   :  { %v1021_v55 = vpop.f32.mrf.mxu1 }
 0x217   :  { %v1438_v11 = vadd.f32 %v1021_v55, %v1359_v43  ;;  %v428_v32 = vmul.f32 0.70710677, %v1461_v22 }
 0x218   :  { %v376_v56 = vpop.f32.mrf.mxu1 }
 0x219   :  { %v433_v12 = vmul.f32 0.70710677, %v1438_v11  ;;  %v1448_v13 = vadd.f32 %v1359_v43, %v376_v56 }
 0x21a   :  { %v1022_v57 = vpop.f32.mrf.mxu1 }
 0x21b   :  { %v1434_v58 = vadd.f32 %v1022_v57, %v1359_v43  ;;  %v431_v59 = vmul.f32 0.70710677, %v1448_v13 }
 0x21c   :  { %v379_v52 = vpop.f32.mrf.mxu1 }
 0x21d   :  { %v434_v45 = vmul.f32 0.70710677, %v1434_v58  ;;  %v1443_v5 = vadd.f32 %v1359_v43, %v379_v52  ;;  %v418_v52 = vmul.f32 0.5, %v1434_v58 }
 0x21e   :  { %v1025_v60 = vpop.f32.mrf.mxu1 }
 0x21f   :  { %v401_v61 = vadd.f32 %v1025_v60, %v1359_v43  ;;  %v432_v17 = vmul.f32 0.70710677, %v1443_v5 }
 0x220   :  { %v392_v63 = vpop.f32.mrf.mxu1 }
 0x221   :  { %v437_v0 = vmul.f32 0.70710677, %v401_v61  ;;  %v393_v2 = vadd.f32 %v1359_v43, %v392_v63  ;;  %v421_v42 = vmul.f32 0.5, %v401_v61 }
 0x222   :  { %v1026_v3 = vpop.f32.mrf.mxu1 }
 0x223   :  { %1135 = verf.f32 %v437_v0  ;;  %v404_v49 = vadd.f32 %v1026_v3, %v1359_v43  ;;  %v435_v8 = vmul.f32 0.70710677, %v393_v2  ;;  %v419_v53 = vmul.f32 0.5, %v393_v2 }
 0x224   :  { %v395_v9 = vpop.f32.mrf.mxu1  ;;  %1137 = verf.f32 %v434_v45  ;;  %v417_v0 = vmul.f32 0.5, %v1438_v11 }
 0x225   :  { %v438_v14 = vmul.f32 0.70710677, %v404_v49  ;;  %1139 = verf.f32 %v435_v8  ;;  %v396_v15 = vadd.f32 %v1359_v43, %v395_v9  ;;  %v422_v33 = vmul.f32 0.5, %v404_v49 }
 0x227   :  { %1141 = verf.f32 %v438_v14  ;;  %v436_v18 = vmul.f32 0.70710677, %v396_v15  ;;  %v420_v55 = vmul.f32 0.5, %v396_v15  ;;  %v416_v14 = vmul.f32 0.5, %v1443_v5 }
 0x228   :  { %1143 = verf.f32 %v433_v12 }
 0x229   :  { %1145 = verf.f32 %v436_v18 }
 0x22a   :  { %1147 = verf.f32 %v432_v17  ;;  %v415_v17 = vmul.f32 0.5, %v1448_v13 }
 0x22b   :  { %1149 = verf.f32 %v431_v59 }
 0x22c   :  { %1151 = verf.f32 %v430_v21 }
 0x22d   :  { %1153 = verf.f32 %v429_v23  ;;  %v414_v23 = vmul.f32 0.5, %v1452_v54 }
 0x22e   :  { %1155 = verf.f32 %v428_v32 }
 0x22f   :  { %1157 = verf.f32 %v427_v36 }
 0x230   :  { %v1136_v34 = vpop.eup %1135  ;;  %1159 = verf.f32 %v426_v37 }
 0x231   :  { %v1138_v35 = vpop.eup %1137  ;;  %v469_v40 = vadd.f32 1.0, %v1136_v34  ;;  %1161 = verf.f32 %v425_v41  ;;  %v412_v41 = vmul.f32 0.5, %v1461_v22 }
 0x232   :  { %v1140_v38 = vpop.eup %1139  ;;  %v466_v47 = vadd.f32 1.0, %v1138_v35  ;;  %1163 = verf.f32 %v424_v20  ;;  %v413_v35 = vmul.f32 0.5, %v1456_v19  ;;  %v410_v19 = vmul.f32 0.5, %v1468_v24 }
 0x233   :  { %v467_v46 = vadd.f32 1.0, %v1140_v38  ;;  %v485_v48 = vmul.f32 %v469_v40, %v421_v42  ;;  %1165 = verf.f32 %v423_v16 }
 0x234   :  { %v1142_v4 = vpop.eup %1141  ;;  %v482_v3 = vmul.f32 %v466_v47, %v418_v52  ;;  %v409_v47 = vmul.f32 0.5, %v1472_v1 }
 0x235   :  { %v470_v44 = vadd.f32 1.0, %v1142_v4  ;;  %v1144_v7 = vpop.eup %1143  ;;  %v483_v63 = vmul.f32 %v467_v46, %v419_v53 }
 0x236   :  { %v1146_v10 = vpop.eup %1145  ;;  %v465_v57 = vadd.f32 1.0, %v1144_v7 }
 0x237   :  { %v486_v50 = vmul.f32 %v470_v44, %v422_v33  ;;  %v1148_v51 = vpop.eup %1147  ;;  %v468_v56 = vadd.f32 1.0, %v1146_v10  ;;  %v411_v33 = vmul.f32 0.5, %v1465_v62  ;;  %v408_v62 = vmul.f32 0.5, %v1477_v39 }
 0x238   :  { %v1150_v61 = vpop.eup %1149  ;;  %v464_v49 = vadd.f32 1.0, %v1148_v51  ;;  %v481_v9 = vmul.f32 %v465_v57, %v417_v0 }
 0x239   :  { %v494_v60 = vpack.c.bf16 %v486_v50, %v485_v48  ;;  %v484_v45 = vmul.f32 %v468_v56, %v420_v55  ;;  %v1152_v8 = vpop.eup %1151  ;;  %v463_v12 = vadd.f32 1.0, %v1150_v61  ;;  %v407_v55 = vmul.f32 0.5, %v1481_v6 }
 0x23a   :  { %v1154_v15 = vpop.eup %1153  ;;  %v462_v58 = vadd.f32 1.0, %v1152_v8  ;;  %v480_v18 = vmul.f32 %v464_v49, %v416_v14  ;;  %v492_v59 = vpack.c.bf16 %v482_v3, %v481_v9 }
 0x23b   :  { %1027 = vmatprep.subr.bf16.mxu0 %v494_v60  ;;  %v493_v2 = vpack.c.bf16 %v484_v45, %v483_v63  ;;  %v1156_v21 = vpop.eup %1155  ;;  %v461_v11 = vadd.f32 1.0, %v1154_v15  ;;  %v479_v32 = vmul.f32 %v463_v12, %v415_v17 }
 0x23c   :  { %1028 = vmatpush3.bf16.msra.mxu0 %v494_v60  ;;  %v1158_v34 = vpop.eup %1157  ;;  %v478_v37 = vmul.f32 %v462_v58, %v414_v23  ;;  %v460_v5 = vadd.f32 1.0, %v1156_v21 }
 0x23d   :  { %1029 = vmatprep.subr.bf16.mxu0 %v493_v2  ;;  %v1160_v36 = vpop.eup %1159  ;;  %v491_v38 = vpack.c.bf16 %v480_v18, %v479_v32  ;;  %v477_v4 = vmul.f32 %v461_v11, %v413_v35  ;;  %v459_v13 = vadd.f32 1.0, %v1158_v34 }
 0x23e   :  { %v1162_v40 = vpop.eup %1161  ;;  %v458_v42 = vadd.f32 1.0, %v1160_v36  ;;  %v476_v54 = vmul.f32 %v460_v5, %v412_v41 }
 0x23f   :  { %v490_v44 = vpack.c.bf16 %v478_v37, %v477_v4  ;;  %v1164_v7 = vpop.eup %1163  ;;  %v457_v46 = vadd.f32 1.0, %v1162_v40  ;;  %v475_v10 = vmul.f32 %v459_v13, %v411_v33 }
 0x240   :  { %1030 = vmatpush3.bf16.msra.mxu0 %v493_v2  ;;  %v1166_v20 = vpop.eup %1165  ;;  %v474_v48 = vmul.f32 %v458_v42, %v410_v19  ;;  %v456_v50 = vadd.f32 1.0, %v1164_v7 }
 0x241   :  { %1031 = vmatprep.subr.bf16.mxu0 %v492_v59  ;;  %v489_v51 = vpack.c.bf16 %v476_v54, %v475_v10  ;;  %v473_v22 = vmul.f32 %v457_v46, %v409_v47  ;;  %v455_v53 = vadd.f32 1.0, %v1166_v20 }
 0x242   :  { %v472_v56 = vmul.f32 %v456_v50, %v408_v62 }
 0x243   :  { %v488_v16 = vpack.c.bf16 %v474_v48, %v473_v22  ;;  %v471_v24 = vmul.f32 %v455_v53, %v407_v55 }
 0x244   :  { %1032 = vmatpush3.bf16.msra.mxu0 %v492_v59 }
 0x245   :  { %1033 = vmatprep.subr.bf16.mxu0 %v491_v38  ;;  %v487_v57 = vpack.c.bf16 %v472_v56, %v471_v24 }
 0x248   :  { %1034 = vmatpush3.bf16.msra.mxu0 %v491_v38 }
 0x249   :  { %1035 = vmatprep.subr.bf16.mxu0 %v490_v44 }
 0x24c   :  { %1036 = vmatpush3.bf16.msra.mxu0 %v490_v44 }
 0x24d   :  { %1037 = vmatprep.subr.bf16.mxu0 %v489_v51 }
 0x250   :  { %1038 = vmatpush3.bf16.msra.mxu0 %v489_v51 }
 0x251   :  { %1039 = vmatprep.subr.bf16.mxu0 %v488_v16 }
 0x254   :  { %1040 = vmatpush3.bf16.msra.mxu0 %v488_v16 }
 0x255   :  { %1041 = vmatprep.subr.bf16.mxu0 %v487_v57 }
 0x258   :  { %1042 = vmatpush3.bf16.msra.mxu0 %v487_v57 }
 0x25b   :  { %1044 = vmatmul.mubr.bf16.vlgmr.msra.gmra.mxu0 %v1316_v25 }
 0x25c   :  { %1047 = vmatprep.mubr.bf16.mxu0 %v1321_v26 }
 0x263   :  { %1048 = vmatmul.mubr.bf16.gmra.mxu0 %v1328_v27 }
 0x264   :  { %1051 = vmatprep.mubr.bf16.mxu0 %v1333_v28 }
 0x26b   :  { %1052 = vmatmul.mubr.bf16.gmra.mxu0 %v1340_v29 }
 0x26c   :  { %1055 = vmatprep.mubr.bf16.mxu0 %v1345_v30 }
 0x273   :  { %1056 = vmatmul.mubr.bf16.gmra.mxu0 %v1352_v31 }
 0x31b   :  { %v1045_v1 = vpop.f32.mrf.mxu0 }
 0x31c   :  { %v1543_v19 = vadd.f32 %v1045_v1, %v1359_v43 }
 0x31d   :  { %v529_v39 = vpop.f32.mrf.mxu0 }
 0x31e   :  { %v610_v53 = vmul.f32 0.70710677, %v1543_v19  ;;  %v1552_v62 = vadd.f32 %v1359_v43, %v529_v39 }
 0x31f   :  { %v1046_v6 = vpop.f32.mrf.mxu0 }
 0x320   :  { %v1539_v44 = vadd.f32 %v1046_v6, %v1359_v43  ;;  %v608_v39 = vmul.f32 0.70710677, %v1552_v62 }
 0x321   :  { %v532_v52 = vpop.f32.mrf.mxu0 }
 0x322   :  { %v611_v47 = vmul.f32 0.70710677, %v1539_v44  ;;  %v1548_v50 = vadd.f32 %v1359_v43, %v532_v52 }
 0x323   :  { %v1049_v60 = vpop.f32.mrf.mxu0 }
 0x324   :  { %v1527_v4 = vadd.f32 %v1049_v60, %v1359_v43  ;;  %v609_v6 = vmul.f32 0.70710677, %v1548_v50 }
 0x325   :  { %v545_v61 = vpop.f32.mrf.mxu0 }
 0x326   :  { %v614_v33 = vmul.f32 0.70710677, %v1527_v4  ;;  %v1536_v54 = vadd.f32 %v1359_v43, %v545_v61 }
 0x327   :  { %v1050_v63 = vpop.f32.mrf.mxu0 }
 0x328   :  { %v1523_v5 = vadd.f32 %v1050_v63, %v1359_v43  ;;  %v612_v10 = vmul.f32 0.70710677, %v1536_v54 }
 0x329   :  { %v548_v45 = vpop.f32.mrf.mxu0 }
 0x32a   :  { %v615_v41 = vmul.f32 0.70710677, %v1523_v5  ;;  %v1532_v42 = vadd.f32 %v1359_v43, %v548_v45 }
 0x32b   :  { %v1053_v0 = vpop.f32.mrf.mxu0 }
 0x32c   :  { %v1509_v15 = vadd.f32 %v1053_v0, %v1359_v43  ;;  %v613_v7 = vmul.f32 0.70710677, %v1532_v42 }
 0x32d   :  { %v561_v3 = vpop.f32.mrf.mxu0 }
 0x32e   :  { %v618_v34 = vmul.f32 0.70710677, %v1509_v15  ;;  %v1519_v36 = vadd.f32 %v1359_v43, %v561_v3 }
 0x32f   :  { %v1054_v49 = vpop.f32.mrf.mxu0 }
 0x330   :  { %v1505_v2 = vadd.f32 %v1054_v49, %v1359_v43  ;;  %v616_v13 = vmul.f32 0.70710677, %v1519_v36 }
 0x331   :  { %v564_v8 = vpop.f32.mrf.mxu0 }
 0x332   :  { %v619_v58 = vmul.f32 0.70710677, %v1505_v2  ;;  %v1514_v21 = vadd.f32 %v1359_v43, %v564_v8  ;;  %v603_v8 = vmul.f32 0.5, %v1505_v2 }
 0x333   :  { %v1057_v9 = vpop.f32.mrf.mxu0 }
 0x334   :  { %v586_v12 = vadd.f32 %v1057_v9, %v1359_v43  ;;  %v617_v38 = vmul.f32 0.70710677, %v1514_v21 }
 0x335   :  { %v577_v14 = vpop.f32.mrf.mxu0 }
 0x336   :  { %v622_v17 = vmul.f32 0.70710677, %v586_v12  ;;  %v578_v18 = vadd.f32 %v1359_v43, %v577_v14  ;;  %v606_v55 = vmul.f32 0.5, %v586_v12 }
 0x337   :  { %v1058_v59 = vpop.f32.mrf.mxu0 }
 0x338   :  { %1167 = verf.f32 %v622_v17  ;;  %v589_v11 = vadd.f32 %v1058_v59, %v1359_v43  ;;  %v620_v23 = vmul.f32 0.70710677, %v578_v18  ;;  %v604_v45 = vmul.f32 0.5, %v578_v18 }
 0x339   :  { %v580_v32 = vpop.f32.mrf.mxu0  ;;  %1169 = verf.f32 %v619_v58  ;;  %v602_v17 = vmul.f32 0.5, %v1509_v15 }
 0x33a   :  { %v623_v35 = vmul.f32 0.70710677, %v589_v11  ;;  %1171 = verf.f32 %v620_v23  ;;  %v581_v37 = vadd.f32 %v1359_v43, %v580_v32  ;;  %v607_v56 = vmul.f32 0.5, %v589_v11 }
 0x33c   :  { %1173 = verf.f32 %v623_v35  ;;  %v621_v40 = vmul.f32 0.70710677, %v581_v37  ;;  %v605_v0 = vmul.f32 0.5, %v581_v37  ;;  %v601_v35 = vmul.f32 0.5, %v1514_v21 }
 0x33d   :  { %1175 = verf.f32 %v618_v34 }
 0x33e   :  { %1177 = verf.f32 %v621_v40 }
 0x33f   :  { %1179 = verf.f32 %v617_v38  ;;  %v600_v38 = vmul.f32 0.5, %v1519_v36 }
 0x340   :  { %1181 = verf.f32 %v616_v13 }
 0x341   :  { %1183 = verf.f32 %v615_v41 }
 0x342   :  { %1185 = verf.f32 %v614_v33  ;;  %v599_v33 = vmul.f32 0.5, %v1523_v5 }
 0x343   :  { %1187 = verf.f32 %v613_v7 }
 0x344   :  { %1189 = verf.f32 %v612_v10 }
 0x345   :  { %v1168_v46 = vpop.eup %1167  ;;  %1191 = verf.f32 %v611_v47 }
 0x346   :  { %v1170_v20 = vpop.eup %1169  ;;  %v654_v51 = vadd.f32 1.0, %v1168_v46  ;;  %1193 = verf.f32 %v610_v53  ;;  %v597_v53 = vmul.f32 0.5, %v1532_v42 }
 0x347   :  { %v1172_v48 = vpop.eup %1171  ;;  %v651_v52 = vadd.f32 1.0, %v1170_v20  ;;  %1195 = verf.f32 %v609_v6  ;;  %v598_v20 = vmul.f32 0.5, %v1527_v4  ;;  %v595_v4 = vmul.f32 0.5, %v1539_v44 }
 0x348   :  { %v652_v57 = vadd.f32 1.0, %v1172_v48  ;;  %v670_v60 = vmul.f32 %v654_v51, %v606_v55  ;;  %1197 = verf.f32 %v608_v39 }
 0x349   :  { %v1174_v22 = vpop.eup %1173  ;;  %v667_v59 = vmul.f32 %v651_v52, %v603_v8  ;;  %v594_v52 = vmul.f32 0.5, %v1543_v19 }
 0x34a   :  { %v655_v16 = vadd.f32 1.0, %v1174_v22  ;;  %v1176_v24 = vpop.eup %1175  ;;  %v668_v14 = vmul.f32 %v652_v57, %v604_v45 }
 0x34b   :  { %v1178_v1 = vpop.eup %1177  ;;  %v650_v49 = vadd.f32 1.0, %v1176_v24 }
 0x34c   :  { %v671_v61 = vmul.f32 %v655_v16, %v607_v56  ;;  %v1180_v63 = vpop.eup %1179  ;;  %v653_v3 = vadd.f32 1.0, %v1178_v1  ;;  %v596_v56 = vmul.f32 0.5, %v1536_v54  ;;  %v593_v54 = vmul.f32 0.5, %v1548_v50 }
 0x34d   :  { %v1182_v12 = vpop.eup %1181  ;;  %v649_v11 = vadd.f32 1.0, %v1180_v63  ;;  %v666_v32 = vmul.f32 %v650_v49, %v602_v17 }
 0x34e   :  { %v679_v9 = vpack.c.bf16 %v671_v61, %v670_v60  ;;  %v669_v58 = vmul.f32 %v653_v3, %v605_v0  ;;  %v1184_v23 = vpop.eup %1183  ;;  %v648_v34 = vadd.f32 1.0, %v1182_v12  ;;  %v592_v0 = vmul.f32 0.5, %v1552_v62 }
 0x34f   :  { %v1186_v37 = vpop.eup %1185  ;;  %v647_v2 = vadd.f32 1.0, %v1184_v23  ;;  %v665_v40 = vmul.f32 %v649_v11, %v601_v35  ;;  %v677_v13 = vpack.c.bf16 %v667_v59, %v666_v32 }
 0x350   :  { %1059 = vmatprep.subr.bf16.mxu1 %v679_v9  ;;  %v678_v18 = vpack.c.bf16 %v669_v58, %v668_v14  ;;  %v1188_v41 = vpop.eup %1187  ;;  %v646_v15 = vadd.f32 1.0, %v1186_v37  ;;  %v664_v7 = vmul.f32 %v648_v34, %v600_v38 }
 0x351   :  { %1060 = vmatpush3.bf16.msra.mxu1 %v679_v9  ;;  %v1190_v46 = vpop.eup %1189  ;;  %v663_v47 = vmul.f32 %v647_v2, %v599_v33  ;;  %v645_v21 = vadd.f32 1.0, %v1188_v41 }
 0x352   :  { %1061 = vmatprep.subr.bf16.mxu1 %v678_v18  ;;  %v1192_v10 = vpop.eup %1191  ;;  %v676_v48 = vpack.c.bf16 %v665_v40, %v664_v7  ;;  %v662_v22 = vmul.f32 %v646_v15, %v598_v20  ;;  %v644_v36 = vadd.f32 1.0, %v1190_v46 }
 0x353   :  { %v1194_v51 = vpop.eup %1193  ;;  %v643_v55 = vadd.f32 1.0, %v1192_v10  ;;  %v661_v5 = vmul.f32 %v645_v21, %v597_v53 }
 0x354   :  { %v675_v16 = vpack.c.bf16 %v663_v47, %v662_v22  ;;  %v1196_v24 = vpop.eup %1195  ;;  %v642_v57 = vadd.f32 1.0, %v1194_v51  ;;  %v660_v1 = vmul.f32 %v644_v36, %v596_v56 }
 0x355   :  { %1062 = vmatpush3.bf16.msra.mxu1 %v678_v18  ;;  %v1198_v6 = vpop.eup %1197  ;;  %v659_v60 = vmul.f32 %v643_v55, %v595_v4  ;;  %v641_v61 = vadd.f32 1.0, %v1196_v24 }
 0x356   :  { %1063 = vmatprep.subr.bf16.mxu1 %v677_v13  ;;  %v674_v63 = vpack.c.bf16 %v661_v5, %v660_v1  ;;  %v658_v42 = vmul.f32 %v642_v57, %v594_v52  ;;  %v640_v45 = vadd.f32 1.0, %v1198_v6 }
 0x357   :  { %v657_v3 = vmul.f32 %v641_v61, %v593_v54 }
 0x358   :  { %v673_v39 = vpack.c.bf16 %v659_v60, %v658_v42  ;;  %v656_v44 = vmul.f32 %v640_v45, %v592_v0 }
 0x359   :  { %1064 = vmatpush3.bf16.msra.mxu1 %v677_v13 }
 0x35a   :  { %1065 = vmatprep.subr.bf16.mxu1 %v676_v48  ;;  %v672_v49 = vpack.c.bf16 %v657_v3, %v656_v44 }
 0x35d   :  { %1066 = vmatpush3.bf16.msra.mxu1 %v676_v48  ;;  %v1231_v48 = vld [vmem:[%s1615_s1] ss:$0 sm:$0xff]  ;;  %s1279_s1 = smov [#allocation5]  }
 0x35e   :  { %1067 = vmatprep.subr.bf16.mxu1 %v675_v16  ;;  %s878_s10 = sshll.u32 %s1279_s1, 4  ;;  %s879_s10 = int_to_ptr.vmem [resolvable:$true] %s878_s10 }
 0x35f   :  { %s1252_s11 = scalar_lea.vmem %s879_s10, 2048  ;;  %p1257_p6 = scmp.lt.s32.totalorder %s879_s10, %s879_s10 }
 0x360   :  { %p1253_p5 = scmp.ne.s32.totalorder %s879_s10, %s1252_s11  ;;  %p1258_p7 = scmp.lt.s32.totalorder %s1252_s11, %s1252_s11 }
 0x361   :  { %1068 = vmatpush3.bf16.msra.mxu1 %v675_v16 }
 0x362   :  { %1069 = vmatprep.subr.bf16.mxu1 %v674_v63  ;;  %p1259_p8 = por %p1258_p7, %p1257_p6 }
 0x364   :  { %p1260_p9 = pnand %p1259_p8, %p1253_p5 }
 0x365   :  { %1070 = vmatpush3.bf16.msra.mxu1 %v674_v63 }
 0x366   :  { %1071 = vmatprep.subr.bf16.mxu1 %v673_v39 }
 0x369   :  { %1072 = vmatpush3.bf16.msra.mxu1 %v673_v39 }
 0x36a   :  { %1073 = vmatprep.subr.bf16.mxu1 %v672_v49 }
 0x36d   :  { %1074 = vmatpush3.bf16.msra.mxu1 %v672_v49 }
 0x370   :  { %1076 = vmatmul.mubr.bf16.vlgmr.msra.gmra.mxu1 %v1316_v25 }
 0x371   :  { %1079 = vmatprep.mubr.bf16.mxu1 %v1321_v26 }
 0x378   :  { %1080 = vmatmul.mubr.bf16.gmra.mxu1 %v1328_v27 }
 0x379   :  { %1083 = vmatprep.mubr.bf16.mxu1 %v1333_v28 }
 0x380   :  { %1084 = vmatmul.mubr.bf16.gmra.mxu1 %v1340_v29 }
 0x381   :  { %1087 = vmatprep.mubr.bf16.mxu1 %v1345_v30 }
 0x388   :  { %1088 = vmatmul.mubr.bf16.gmra.mxu1 %v1352_v31 }
 0x430   :  { %v1077_v19 = vpop.f32.mrf.mxu1 }
 0x431   :  { %v723_v50 = vadd.f32 %v1077_v19, %v1359_v43 }
 0x432   :  { %v714_v62 = vpop.f32.mrf.mxu1 }
 0x433   :  { %v795_v8 = vmul.f32 0.70710677, %v723_v50  ;;  %v715_v9 = vadd.f32 %v1359_v43, %v714_v62  ;;  %v779_v41 = vmul.f32 0.5, %v723_v50 }
 0x434   :  { %v1078_v25 = vpop.f32.mrf.mxu1 }
 0x435   :  { %1199 = verf.f32 %v795_v8  ;;  %v793_v26 = vmul.f32 0.70710677, %v715_v9  ;;  %v726_v27 = vadd.f32 %v1078_v25, %v1359_v43  ;;  %v777_v46 = vmul.f32 0.5, %v715_v9 }
 0x436   :  { %v717_v12 = vpop.f32.mrf.mxu1 }
 0x437   :  { %1201 = verf.f32 %v793_v26  ;;  %v796_v28 = vmul.f32 0.70710677, %v726_v27  ;;  %v718_v29 = vadd.f32 %v1359_v43, %v717_v12  ;;  %v780_v56 = vmul.f32 0.5, %v726_v27 }
 0x438   :  { %v1081_v30 = vpop.f32.mrf.mxu1 }
 0x439   :  { %1203 = verf.f32 %v796_v28  ;;  %v794_v31 = vmul.f32 0.70710677, %v718_v29  ;;  %v739_v14 = vadd.f32 %v1081_v30, %v1359_v43  ;;  %v778_v24 = vmul.f32 0.5, %v718_v29 }
 0x43a   :  { %v730_v58 = vpop.f32.mrf.mxu1 }
 0x43b   :  { %1205 = verf.f32 %v794_v31  ;;  %v799_v17 = vmul.f32 0.70710677, %v739_v14  ;;  %v731_v59 = vadd.f32 %v1359_v43, %v730_v58  ;;  %v783_v45 = vmul.f32 0.5, %v739_v14 }
 0x43c   :  { %v1082_v11 = vpop.f32.mrf.mxu1 }
 0x43d   :  { %1207 = verf.f32 %v799_v17  ;;  %v797_v23 = vmul.f32 0.70710677, %v731_v59  ;;  %v1582_v18 = vadd.f32 %v1082_v11, %v1359_v43  ;;  %v781_v39 = vmul.f32 0.5, %v731_v59 }
 0x43e   :  { %v733_v32 = vpop.f32.mrf.mxu1 }
 0x43f   :  { %1209 = verf.f32 %v797_v23  ;;  %v800_v34 = vmul.f32 0.70710677, %v1582_v18  ;;  %v1586_v35 = vadd.f32 %v1359_v43, %v733_v32  ;;  %v784_v27 = vmul.f32 0.5, %v1582_v18 }
 0x440   :  { %v1085_v37 = vpop.f32.mrf.mxu1 }
 0x441   :  { %1211 = verf.f32 %v800_v34  ;;  %v798_v2 = vmul.f32 0.70710677, %v1586_v35  ;;  %v1590_v38 = vadd.f32 %v1085_v37, %v1359_v43  ;;  %v782_v14 = vmul.f32 0.5, %v1586_v35 }
 0x442   :  { %v1200_v40 = vpop.eup %1199  ;;  %v746_v13 = vpop.f32.mrf.mxu1 }
 0x443   :  { %v827_v15 = vadd.f32 1.0, %v1200_v40  ;;  %1213 = verf.f32 %v798_v2  ;;  %v803_v33 = vmul.f32 0.70710677, %v1590_v38  ;;  %v1594_v10 = vadd.f32 %v1359_v43, %v746_v13 }
 0x444   :  { %v1202_v7 = vpop.eup %1201  ;;  %v1086_v20 = vpop.f32.mrf.mxu1  ;;  %v787_v23 = vmul.f32 0.5, %v1590_v38 }
 0x445   :  { %v843_v47 = vmul.f32 %v827_v15, %v779_v41  ;;  %v825_v21 = vadd.f32 1.0, %v1202_v7  ;;  %1215 = verf.f32 %v803_v33  ;;  %v1599_v51 = vadd.f32 %v1231_v48, %v1086_v20 }
 0x446   :  { %v1204_v22 = vpop.eup %1203  ;;  %v801_v36 = vmul.f32 0.70710677, %v1594_v10  ;;  %v749_v53 = vpop.f32.mrf.mxu1  ;;  %v785_v2 = vmul.f32 0.5, %v1594_v10 }
 0x447   :  { %859 = vst [vmem:[#allocation5 + $0x10] sm:$0xff] %v843_v47  ;;  %v841_v55 = vmul.f32 %v825_v21, %v777_v46  ;;  %v828_v5 = vadd.f32 1.0, %v1204_v22  ;;  %v804_v43 = vmul.f32 0.70710677, %v1599_v51  ;;  %v750_v57 = vadd.f32 %v1231_v48, %v749_v53 }
 0x448   :  { %v1206_v16 = vpop.eup %1205  ;;  %1217 = verf.f32 %v801_v36  ;;  %v1089_v4 = vpop.f32.mrf.mxu1  ;;  %v788_v35 = vmul.f32 0.5, %v1599_v51 }
 0x449   :  { %857 = vst [vmem:[#allocation5] sm:$0xff] %v841_v55  ;;  %v844_v1 = vmul.f32 %v828_v5, %v780_v56  ;;  %v826_v6 = vadd.f32 1.0, %v1206_v16  ;;  %1219 = verf.f32 %v804_v43  ;;  %v771_v52 = vadd.f32 %v1231_v48, %v1089_v4 }
 0x44a   :  { %v1208_v60 = vpop.eup %1207  ;;  %v802_v61 = vmul.f32 0.70710677, %v750_v57  ;;  %v762_v63 = vpop.f32.mrf.mxu1  ;;  %v786_v46 = vmul.f32 0.5, %v750_v57 }
 0x44b   :  { %860 = vst [vmem:[#allocation5 + $0x18] sm:$0xff] %v844_v1  ;;  %v842_v42 = vmul.f32 %v826_v6, %v778_v24  ;;  %v831_v54 = vadd.f32 1.0, %v1208_v60  ;;  %v807_v0 = vmul.f32 0.70710677, %v771_v52  ;;  %v763_v44 = vadd.f32 %v1231_v48, %v762_v63 }
 0x44c   :  { %v1210_v3 = vpop.eup %1209  ;;  %1221 = verf.f32 %v802_v61  ;;  %v1090_v49 = vpop.f32.mrf.mxu1  ;;  %v791_v20 = vmul.f32 0.5, %v771_v52 }
 0x44d   :  { %858 = vst [vmem:[#allocation5 + $0x8] sm:$0xff] %v842_v42  ;;  %v847_v19 = vmul.f32 %v831_v54, %v783_v45  ;;  %v829_v50 = vadd.f32 1.0, %v1210_v3  ;;  %1223 = verf.f32 %v807_v0  ;;  %v774_v62 = vadd.f32 %v1231_v48, %v1090_v49 }
 0x44e   :  { %v1212_v8 = vpop.eup %1211  ;;  %v805_v9 = vmul.f32 0.70710677, %v763_v44  ;;  %v765_v25 = vpop.f32.mrf.mxu1  ;;  %v789_v10 = vmul.f32 0.5, %v763_v44 }
 0x44f   :  { %863 = vst [vmem:[#allocation5 + $0x30] sm:$0xff] %v847_v19  ;;  %v845_v26 = vmul.f32 %v829_v50, %v781_v39  ;;  %v832_v12 = vadd.f32 1.0, %v1212_v8  ;;  %v808_v28 = vmul.f32 0.70710677, %v774_v62  ;;  %v766_v30 = vadd.f32 %v1231_v48, %v765_v25 }
 0x450   :  { %v1214_v29 = vpop.eup %1213  ;;  %1225 = verf.f32 %v805_v9  ;;  %v792_v51 = vmul.f32 0.5, %v774_v62 }
 0x451   :  { %861 = vst [vmem:[#allocation5 + $0x20] sm:$0xff] %v845_v26  ;;  %v848_v31 = vmul.f32 %v832_v12, %v784_v27  ;;  %v830_v58 = vadd.f32 1.0, %v1214_v29  ;;  %1227 = verf.f32 %v808_v28  ;;  %v806_v59 = vmul.f32 0.70710677, %v766_v30 }
 0x452   :  { %v1216_v17 = vpop.eup %1215  ;;  %v790_v16 = vmul.f32 0.5, %v766_v30 }
 0x453   :  { %864 = vst [vmem:[#allocation5 + $0x38] sm:$0xff] %v848_v31  ;;  %v846_v11 = vmul.f32 %v830_v58, %v782_v14  ;;  %v835_v32 = vadd.f32 1.0, %v1216_v17  ;;  %1229 = verf.f32 %v806_v59 }
 0x455   :  { %v1218_v18 = vpop.eup %1217  ;;  %862 = vst [vmem:[#allocation5 + $0x28] sm:$0xff] %v846_v11  ;;  %v851_v34 = vmul.f32 %v835_v32, %v787_v23 }
 0x456   :  { %v1220_v37 = vpop.eup %1219  ;;  %v833_v40 = vadd.f32 1.0, %v1218_v18 }
 0x457   :  { %867 = vst [vmem:[#allocation5 + $0x50] sm:$0xff] %v851_v34  ;;  %v836_v13 = vadd.f32 1.0, %v1220_v37 }
 0x458   :  { %v849_v41 = vmul.f32 %v833_v40, %v785_v2 }
 0x459   :  { %v1222_v15 = vpop.eup %1221  ;;  %v852_v33 = vmul.f32 %v836_v13, %v788_v35 }
 0x45a   :  { %v1224_v7 = vpop.eup %1223  ;;  %865 = vst [vmem:[#allocation5 + $0x40] sm:$0xff] %v849_v41  ;;  %v834_v38 = vadd.f32 1.0, %v1222_v15 }
 0x45b   :  { %868 = vst [vmem:[#allocation5 + $0x58] sm:$0xff] %v852_v33  ;;  %v839_v47 = vadd.f32 1.0, %v1224_v7 }
 0x45c   :  { %v850_v21 = vmul.f32 %v834_v38, %v786_v46 }
 0x45d   :  { %v1226_v48 = vpop.eup %1225  ;;  %v855_v22 = vmul.f32 %v839_v47, %v791_v20 }
 0x45e   :  { %v1228_v36 = vpop.eup %1227  ;;  %866 = vst [vmem:[#allocation5 + $0x48] sm:$0xff] %v850_v21  ;;  %v837_v53 = vadd.f32 1.0, %v1226_v48 }
 0x45f   :  { %871 = vst [vmem:[#allocation5 + $0x70] sm:$0xff] %v855_v22  ;;  %v840_v55 = vadd.f32 1.0, %v1228_v36 }
 0x460   :  { %v853_v56 = vmul.f32 %v837_v53, %v789_v10  ;;  %v1230_v5 = vpop.eup %1229 }
 0x461   :  { %v856_v43 = vmul.f32 %v840_v55, %v792_v51  ;;  %v838_v24 = vadd.f32 1.0, %v1230_v5 }
 0x462   :  { %869 = vst [vmem:[#allocation5 + $0x60] sm:$0xff] %v853_v56 }
 0x463   :  { %872 = vst [vmem:[#allocation5 + $0x78] sm:$0xff] %v856_v43  ;;  %v854_v57 = vmul.f32 %v838_v24, %v790_v16 }
 0x465   :  { %870 = vst [vmem:[#allocation5 + $0x68] sm:$0xff] %v854_v57 }
 0x466   :  { %1263 = shalt.err (!%p1260_p9)
}
 0x467   :  { %884 = dma.vmem_to_hbm [thread:$0]  %s879_s10, 2048, %s1617_s3, [#allocation4], %s1277_s15, %s1277_s15, %s1278_s16  }
 0x468   :  { %1274 = dma.done.wait [#allocation4], 2048  }
 0x469   :  { %1275 = vsyncadd [#allocation4], 4294965248 }
 0x46a   :  { %888 = vsyncpa [#allocation3], 1 }
 0x46b   :  { %889 = vsyncpa [#allocation4], 1 }

</bundles_post_ra>
